<compile_context>
chip_gen: v7x
topology: tpu7x:2x2x1
jax: 0.10.0
libtpu: 0.0.40
codegen_flags: <defaults>
</compile_context>

<pallas_src>
import functools

import jax
import jax.numpy as jnp
from jax import lax
from jax.experimental import pallas as pl
from jax.experimental.pallas import tpu as pltpu

EPS = 1e-5  # PyTorch GroupNorm default


# --------------------------------------------------------------------------------------
# VMEM sizing helpers (generation aware).
# --------------------------------------------------------------------------------------
def _vmem_capacity_bytes():
    """Physical VMEM per TensorCore; conservative 64 MiB (v7x) if the query fails."""
    try:
        info = pltpu.get_tpu_info()
        cap = getattr(info, "vmem_capacity_bytes", None)
        if cap:
            return int(cap)
    except Exception:
        pass
    return 64 * 1024 * 1024


def _vmem_limit(need, capacity):
    """Scoped-VMEM request: at least 32 MiB, never more than ~85% of physical VMEM."""
    hi = int(capacity * 0.85)
    lo = min(32 << 20, hi)
    return int(min(max(int(need), lo), hi))


def _choose_tile(hw, per_col_bytes, budget, cap=1024):
    """Lane-dense HW tile: multiple of 128, bounded by the per-pass VMEM slab budget."""
    if hw <= 512:
        return hw                                   # single full-dim block is always legal
    t = (budget // max(per_col_bytes, 1)) // 128 * 128
    return int(max(128, min(t, cap, (hw // 128) * 128)))


def _fused_vmem_need(c, oc4, hw, xb, ob, mmb):
    """Conservative VMEM estimate for the fused whole-batch kernel (bytes)."""
    return (2 * c * hw * xb        # double-buffered input block
            + 2 * oc4 * hw * ob    # double-buffered output block
            + 2 * c * hw * 4       # f32 copy of x + centered copy
            + c * hw * mmb         # SiLU activations in matmul dtype
            + oc4 * hw * 4         # f32 matmul result before cast
            + oc4 * c * mmb        # conv weight
            + (4 << 20))           # headroom for Mosaic internals


# --------------------------------------------------------------------------------------
# Fused single-pass kernel: stats -> normalize -> SiLU -> 1x1 conv   (grid = (B,))
# --------------------------------------------------------------------------------------
def _group_expand(v, groups, cg):
    """(C, 1) per-channel values -> per-group sums broadcast back to (C, 1).

    Only touches leading / sublane dims (lane dim stays 1), which keeps the reshapes in
    Mosaic's well-supported class.
    """
    v3 = v.reshape(groups, cg, 1)
    g = jnp.sum(v3, axis=1, keepdims=True)                     # (G, 1, 1)
    return jnp.broadcast_to(g, (groups, cg, 1)).reshape(groups * cg, 1)


def _upsample_fused_kernel(x_ref, gamma_ref, beta_ref, w_ref, b_ref, o_ref, *,
                           groups, matmul_dtype):
    # x_ref:     (C, HW)     one full batch element (NCHW layout, spatial flattened)
    # gamma_ref: (C, 1)      GroupNorm weight
    # beta_ref:  (C, 1)      GroupNorm bias
    # w_ref:     (OC4, C)    1x1 conv weight (torch layout), already in matmul_dtype
    # b_ref:     (OC4, 1)    conv bias (f32)
    # o_ref:     (OC4, HW)   lane-dense output slab
    x = x_ref[...].astype(jnp.float32)
    c_dim, hw = x.shape
    cg = c_dim // groups
    inv_n = 1.0 / float(cg * hw)

    # Exact (shifted) GroupNorm statistics: mean first, then centered sum of squares.
    s = jnp.sum(x, axis=1, keepdims=True)                       # (C, 1)
    mean_c = _group_expand(s, groups, cg) * inv_n               # per-group mean, per channel
    d = x - mean_c
    ss = jnp.sum(d * d, axis=1, keepdims=True)                  # (C, 1)
    var_c = _group_expand(ss, groups, cg) * inv_n               # per-group var, per channel

    scale = lax.rsqrt(var_c + EPS) * gamma_ref[...]             # (C, 1)
    y = d * scale + beta_ref[...]                               # normalize + affine (FMA)
    h = (y * jax.nn.sigmoid(y)).astype(matmul_dtype)            # SiLU (EUP), cast for MXU

    # 1x1 conv == matmul over channels; f32 MXU accumulation.
    # NOTE: no HBM-side padding of C/OC4 to MXU multiples -- the kernel is HBM-bound, so
    # MXU under-fill is free; padding would only increase the real bottleneck (bytes).
    out = jnp.dot(w_ref[...], h, preferred_element_type=jnp.float32)
    o_ref[...] = (out + b_ref[...]).astype(o_ref.dtype)


def _forward_fused(x_flat, gamma, beta, w_mat, bias, *, groups, matmul_dtype, vmem_limit):
    B, C, HW = x_flat.shape
    OC4 = w_mat.shape[0]
    gamma2 = gamma.reshape(C, 1).astype(jnp.float32)
    beta2 = beta.reshape(C, 1).astype(jnp.float32)

    kernel = functools.partial(_upsample_fused_kernel, groups=groups,
                               matmul_dtype=matmul_dtype)
    return pl.pallas_call(
        kernel,
        out_shape=jax.ShapeDtypeStruct((B, OC4, HW), x_flat.dtype),
        grid_spec=pltpu.PrefetchScalarGridSpec(
            num_scalar_prefetch=0,
            grid=(B,),
            in_specs=[
                pl.BlockSpec((pl.Squeezed(), C, HW), lambda b: (b, 0, 0)),
                pl.BlockSpec((C, 1), lambda b: (0, 0)),
                pl.BlockSpec((C, 1), lambda b: (0, 0)),
                pl.BlockSpec((OC4, C), lambda b: (0, 0)),
                pl.BlockSpec((OC4, 1), lambda b: (0, 0)),
            ],
            out_specs=pl.BlockSpec((pl.Squeezed(), OC4, HW), lambda b: (b, 0, 0)),
        ),
        compiler_params=pltpu.CompilerParams(
            dimension_semantics=("parallel",),          # batches go to separate TCs on v7x
            vmem_limit_bytes=vmem_limit),
    )(x_flat, gamma2, beta2, w_mat, bias)


# --------------------------------------------------------------------------------------
# Two-pass fallback (large shapes): tiled stats pass + tiled main pass.
# --------------------------------------------------------------------------------------
def _gn_stats_kernel(x_ref, sum_ref, sq_ref, *, hw, n_t2):
    # x_ref:   (C, TILE)  one HW tile of one batch element
    # sum_ref: (C, 1)     resident accumulator: sum over this HW shard
    # sq_ref:  (C, 1)     resident accumulator: sum of squares over this HW shard
    s_idx = pl.program_id(1)          # HW shard (parallel; feeds both v7x TCs at B=1)
    t_idx = pl.program_id(2)          # tile within shard (arbitrary / reduction axis)

    @pl.when(t_idx == 0)
    def _():
        sum_ref[...] = jnp.zeros_like(sum_ref)
        sq_ref[...] = jnp.zeros_like(sq_ref)

    x = x_ref[...].astype(jnp.float32)
    tile = x.shape[1]
    if hw % tile != 0:
        # Last tile is partial: padded columns are undefined -> mask them out.
        pos = (s_idx * n_t2 + t_idx) * tile + lax.broadcasted_iota(jnp.int32, x.shape, 1)
        x = jnp.where(pos < hw, x, 0.0)
    sum_ref[...] += jnp.sum(x, axis=1, keepdims=True)
    sq_ref[...] += jnp.sum(x * x, axis=1, keepdims=True)


def _upsample_main_kernel(x_ref, scale_ref, shift_ref, w_ref, b_ref, o_ref, *, matmul_dtype):
    # x_ref:     (C, TILE)    one HW tile of one batch element
    # scale_ref: (C, 1)       per-channel  rstd * gamma
    # shift_ref: (C, 1)       per-channel  beta - mean * rstd * gamma
    # w_ref:     (OC4, C)     1x1 conv weight, already in matmul_dtype
    # b_ref:     (OC4, 1)     conv bias (f32)
    # o_ref:     (OC4, TILE)  lane-dense output tile (OOB edge columns are discarded)
    x = x_ref[...].astype(jnp.float32)
    y = x * scale_ref[...] + shift_ref[...]          # GroupNorm normalize+affine as one FMA
    h = y * jax.nn.sigmoid(y)                        # SiLU (EUP)
    out = jnp.dot(w_ref[...], h.astype(matmul_dtype), preferred_element_type=jnp.float32)
    o_ref[...] = (out + b_ref[...]).astype(o_ref.dtype)


def _forward_two_pass(x_flat, gamma, beta, w_mat, bias, *, groups, matmul_dtype,
                      capacity, tile_override=None):
    B, C, HW = x_flat.shape
    OC4 = w_mat.shape[0]
    xb = jnp.dtype(x_flat.dtype).itemsize
    ob = xb
    mmb = jnp.dtype(matmul_dtype).itemsize
    budget = capacity // 4            # 16 MiB on 64-MiB v7x, 32 MiB on 128-MiB v5e/v6e

    # Per-lane VMEM cost of each pass (double-buffered I/O + in-kernel temporaries).
    per_col_stats = 2 * C * xb + C * 4
    per_col_main = 2 * C * xb + 2 * OC4 * ob + 2 * C * 4 + C * mmb + OC4 * 4
    tile_stats = tile_override or _choose_tile(HW, per_col_stats, budget, cap=2048)
    tile_main = tile_override or _choose_tile(HW, per_col_main, budget, cap=1024)

    n_t_stats = pl.cdiv(HW, tile_stats)
    n_split = 2 if (n_t_stats >= 2 and n_t_stats % 2 == 0) else 1
    n_t2 = n_t_stats // n_split
    n_t_main = pl.cdiv(HW, tile_main)

    vmem_stats = _vmem_limit(per_col_stats * tile_stats + (4 << 20), capacity)
    vmem_main = _vmem_limit(per_col_main * tile_main + OC4 * C * mmb + (4 << 20), capacity)

    # ---- pass 1: per-(batch, shard, channel) sum / sum-of-squares over HW ----
    stats_kernel = functools.partial(_gn_stats_kernel, hw=HW, n_t2=n_t2)
    sum_x, sum_x2 = pl.pallas_call(
        stats_kernel,
        out_shape=(jax.ShapeDtypeStruct((B, n_split, C, 1), jnp.float32),
                   jax.ShapeDtypeStruct((B, n_split, C, 1), jnp.float32)),
        grid_spec=pltpu.PrefetchScalarGridSpec(
            num_scalar_prefetch=0,
            grid=(B, n_split, n_t2),
            in_specs=[pl.BlockSpec((pl.Squeezed(), C, tile_stats),
                                   lambda b, s, t: (b, 0, s * n_t2 + t))],
            out_specs=[pl.BlockSpec((pl.Squeezed(), pl.Squeezed(), C, 1),
                                    lambda b, s, t: (b, s, 0, 0)),
                       pl.BlockSpec((pl.Squeezed(), pl.Squeezed(), C, 1),
                                    lambda b, s, t: (b, s, 0, 0))],
        ),
        compiler_params=pltpu.CompilerParams(
            dimension_semantics=("parallel", "parallel", "arbitrary"),
            vmem_limit_bytes=vmem_stats),
    )(x_flat)
    sum_x = sum_x.sum(axis=1)                                   # (B, C, 1)
    sum_x2 = sum_x2.sum(axis=1)                                 # (B, C, 1)

    # ---- tiny (B, C) glue: group stats -> fused per-channel scale/shift (plain JAX) ----
    cg = C // groups
    n_elem = jnp.float32(HW * cg)
    gsum = sum_x.reshape(B, groups, cg).sum(axis=-1)            # (B, G)
    gsq = sum_x2.reshape(B, groups, cg).sum(axis=-1)            # (B, G)
    mean_g = gsum / n_elem
    # E[x^2]-E[x]^2 in f32 (fine for roughly centered activations); clamp guards cancellation.
    var_g = jnp.maximum(gsq / n_elem - mean_g * mean_g, 0.0)
    rstd_g = lax.rsqrt(var_g + EPS)
    scale_c = jnp.repeat(rstd_g, cg, axis=1) * gamma[None, :].astype(jnp.float32)
    shift_c = beta[None, :].astype(jnp.float32) - jnp.repeat(mean_g, cg, axis=1) * scale_c
    scale_c = scale_c.reshape(B, C, 1)
    shift_c = shift_c.reshape(B, C, 1)

    # ---- pass 2: normalize+affine (FMA) -> SiLU -> 1x1 conv, streamed over HW tiles ----
    main_kernel = functools.partial(_upsample_main_kernel, matmul_dtype=matmul_dtype)
    return pl.pallas_call(
        main_kernel,
        out_shape=jax.ShapeDtypeStruct((B, OC4, HW), x_flat.dtype),
        grid_spec=pltpu.PrefetchScalarGridSpec(
            num_scalar_prefetch=0,
            grid=(B, n_t_main),
            in_specs=[
                pl.BlockSpec((pl.Squeezed(), C, tile_main), lambda b, t: (b, 0, t)),
                pl.BlockSpec((pl.Squeezed(), C, 1), lambda b, t: (b, 0, 0)),
                pl.BlockSpec((pl.Squeezed(), C, 1), lambda b, t: (b, 0, 0)),
                pl.BlockSpec((OC4, C), lambda b, t: (0, 0)),
                pl.BlockSpec((OC4, 1), lambda b, t: (0, 0)),
            ],
            out_specs=pl.BlockSpec((pl.Squeezed(), OC4, tile_main), lambda b, t: (b, 0, t)),
        ),
        compiler_params=pltpu.CompilerParams(
            dimension_semantics=("parallel", "parallel"),
            vmem_limit_bytes=vmem_main),
    )(x_flat, scale_c, shift_c, w_mat, bias)


# --------------------------------------------------------------------------------------
# Public wrapper (matches the PyTorch Upsample forward).
# --------------------------------------------------------------------------------------
def upsample_forward(x_nchw, gamma, beta, conv_w, conv_b, *, groups, out_channels,
                     matmul_dtype=jnp.bfloat16, force_two_pass=False, tile_override=None):
    """x_nchw: (B, C_in, H, W) (f32 or bf16); conv_w: (4*out_ch, C_in) == torch weight[:, :, 0, 0].

    Returns (B, out_channels, 2H, 2W) in x_nchw.dtype, matching the PyTorch module.
    """
    B, C, H, W = x_nchw.shape
    OC4, Cw = conv_w.shape
    assert Cw == C and OC4 == 4 * out_channels
    assert C % groups == 0
    HW = H * W
    x_flat = x_nchw.reshape(B, C, HW)                # contiguous reshape, no HBM transpose

    xb = jnp.dtype(x_flat.dtype).itemsize
    mmb = jnp.dtype(matmul_dtype).itemsize
    capacity = _vmem_capacity_bytes()

    w_mat = conv_w.astype(matmul_dtype)              # (OC4, C) torch layout
    bias = conv_b.reshape(OC4, 1).astype(jnp.float32)

    fused_need = _fused_vmem_need(C, OC4, HW, xb, xb, mmb)
    use_fused = (not force_two_pass) and fused_need <= int(0.7 * capacity)

    y_flat = None
    if use_fused:
        try:
            y_flat = _forward_fused(
                x_flat, gamma, beta, w_mat, bias, groups=groups, matmul_dtype=matmul_dtype,
                vmem_limit=_vmem_limit(fused_need, capacity))
        except Exception:
            y_flat = None                            # fall back to the tiled two-pass path
    if y_flat is None:
        y_flat = _forward_two_pass(
            x_flat, gamma, beta, w_mat, bias, groups=groups, matmul_dtype=matmul_dtype,
            capacity=capacity, tile_override=tile_override)

    # einops: 'b (h1 w1 c) h w -> b c (h h1) (w w1)', h1=w1=2   (pure data movement)
    # TODO(synk): fold this into the kernel store pattern (see header comment).
    y = y_flat.reshape(B, 2, 2, out_channels, H, W)             # (b, h1, w1, c, h, w)
    y = jnp.transpose(y, (0, 3, 4, 1, 5, 2))                    # (b, c, h, h1, w, w1)
    return y.reshape(B, out_channels, 2 * H, 2 * W)


def upsample_reference(x_nchw, gamma, beta, conv_w, conv_b, *, groups, out_channels):
    """Pure-JAX reference matching torch semantics (conv_w in torch (OC4, C_in) layout)."""
    B, C, H, W = x_nchw.shape
    xg = x_nchw.reshape(B, groups, C // groups, H, W)
    mean = xg.mean(axis=(2, 3, 4), keepdims=True)
    var = xg.var(axis=(2, 3, 4), keepdims=True)
    xn = ((xg - mean) / jnp.sqrt(var + EPS)).reshape(B, C, H, W)
    y = xn * gamma[None, :, None, None] + beta[None, :, None, None]
    y = y * jax.nn.sigmoid(y)
    z = jnp.einsum('bchw,oc->bohw', y, conv_w) + conv_b[None, :, None, None]
    z = z.reshape(B, 2, 2, out_channels, H, W)                  # (b, h1, w1, c, h, w)
    z = jnp.transpose(z, (0, 3, 4, 1, 5, 2))                    # (b, c, h, h1, w, w1)
    return z.reshape(B, out_channels, 2 * H, 2 * W)


if __name__ == "__main__":
    B, C_in = 2, 32
    out_channels = 16
    groups = C_in // 16                    # GroupNorm(C//16, C) as in get_norm()
    OC4 = 4 * out_channels

    key = jax.random.PRNGKey(0)
    k_x, k_g, k_b, k_w, k_cb, k_x2 = jax.random.split(key, 6)

    gamma = 1.0 + 0.1 * jax.random.normal(k_g, (C_in,), dtype=jnp.float32)
    beta = 0.1 * jax.random.normal(k_b, (C_in,), dtype=jnp.float32)
    # torch Conv2d(C_in, 4*out_ch, 1) weight, squeezed to (OC4, C_in) -- torch layout.
    conv_w = jax.random.normal(k_w, (OC4, C_in), dtype=jnp.float32) / jnp.sqrt(C_in)
    conv_b = 0.05 * jax.random.normal(k_cb, (OC4,), dtype=jnp.float32)

    # --- config 1: 16x16 spatial, exercises the fused single-pass path ---
    H, W = 16, 16
    x = jax.random.normal(k_x, (B, C_in, H, W), dtype=jnp.float32)
    ref = upsample_reference(x, gamma, beta, conv_w, conv_b,
                             groups=groups, out_channels=out_channels)

    out_f32 = upsample_forward(x, gamma, beta, conv_w, conv_b, groups=groups,
                               out_channels=out_channels, matmul_dtype=jnp.float32)
    out_f32 = jax.block_until_ready(out_f32)
    assert out_f32.shape == (B, out_channels, 2 * H, 2 * W), out_f32.shape
    assert jnp.allclose(out_f32, ref, atol=1e-4, rtol=1e-4), \
        float(jnp.max(jnp.abs(out_f32 - ref)))

    out_bf16 = upsample_forward(x, gamma, beta, conv_w, conv_b, groups=groups,
                                out_channels=out_channels)       # default bf16 MXU operands
    out_bf16 = jax.block_until_ready(out_bf16)
    assert out_bf16.shape == (B, out_channels, 2 * H, 2 * W), out_bf16.shape
    assert jnp.allclose(out_bf16, ref, atol=5e-2, rtol=5e-2), \
        float(jnp.max(jnp.abs(out_bf16 - ref)))

    # --- config 2: 20x20 spatial with a forced 128-wide tile: exercises the two-pass
    # fallback, partial (masked) edge tiles, and the split stats reduction axis ---
    H2, W2 = 20, 20
    x2 = jax.random.normal(k_x2, (B, C_in, H2, W2), dtype=jnp.float32)
    ref2 = upsample_reference(x2, gamma, beta, conv_w, conv_b,
                              groups=groups, out_channels=out_channels)
    out2 = upsample_forward(x2, gamma, beta, conv_w, conv_b, groups=groups,
                            out_channels=out_channels, matmul_dtype=jnp.float32,
                            force_two_pass=True, tile_override=128)
    out2 = jax.block_until_ready(out2)
    assert out2.shape == (B, out_channels, 2 * H2, 2 * W2), out2.shape
    assert jnp.allclose(out2, ref2, atol=1e-4, rtol=1e-4), \
        float(jnp.max(jnp.abs(out2 - ref2)))

    print("KERNEL_OK")
</pallas_src>

<mosaic_0001>
module attributes {stable_mosaic.version = 11 : i64} {
  func.func @_upsample_fused_kernel(%arg0: i32, %arg1: memref<1x32x256xf32, #tpu.memory_space<vmem>>, %arg2: memref<32x1xf32, #tpu.memory_space<vmem>>, %arg3: memref<32x1xf32, #tpu.memory_space<vmem>>, %arg4: memref<64x32xf32, #tpu.memory_space<vmem>>, %arg5: memref<64x1xf32, #tpu.memory_space<vmem>>, %arg6: memref<1x64x256xf32, #tpu.memory_space<vmem>>) attributes {dimension_semantics = [#tpu.dimension_semantics<parallel>], iteration_bounds = array<i64: 2>, scalar_prefetch = 0 : i64, scratch_operands = 0 : i64, tpu.core_type = #tpu.core_type<tc>, window_params = [{transform_indices = @transform_0, window_bounds = array<i64: 1, 32, 256>}, {pipeline_mode = #tpu.pipeline_mode<synchronous>, transform_indices = @transform_1, window_bounds = array<i64: 32, 1>}, {pipeline_mode = #tpu.pipeline_mode<synchronous>, transform_indices = @transform_2, window_bounds = array<i64: 32, 1>}, {pipeline_mode = #tpu.pipeline_mode<synchronous>, transform_indices = @transform_3, window_bounds = array<i64: 64, 32>}, {pipeline_mode = #tpu.pipeline_mode<synchronous>, transform_indices = @transform_4, window_bounds = array<i64: 64, 1>}, {transform_indices = @transform_5, window_bounds = array<i64: 1, 64, 256>}]} {
    %c0 = arith.constant 0 : index
    %c0_0 = arith.constant 0 : index
    %c0_1 = arith.constant 0 : index
    %0 = vector.load %arg1[%c0, %c0_0, %c0_1] : memref<1x32x256xf32, #tpu.memory_space<vmem>>, vector<1x32x256xf32>
    %1 = vector.shape_cast %0 : vector<1x32x256xf32> to vector<32x256xf32>
    %cst = arith.constant dense<0.000000e+00> : vector<32xf32>
    %2 = vector.multi_reduction <add>, %1, %cst [1] : vector<32x256xf32> to vector<32xf32>
    %3 = vector.shape_cast %2 : vector<32xf32> to vector<32x1xf32>
    %4 = vector.shape_cast %3 : vector<32x1xf32> to vector<2x16x1xf32>
    %cst_2 = arith.constant dense<0.000000e+00> : vector<2x1xf32>
    %5 = vector.multi_reduction <add>, %4, %cst_2 [1] : vector<2x16x1xf32> to vector<2x1xf32>
    %6 = vector.shape_cast %5 : vector<2x1xf32> to vector<2x1x1xf32>
    %7 = vector.shape_cast %6 : vector<2x1x1xf32> to vector<2x1x1xf32>
    %8 = vector.broadcast %7 : vector<2x1x1xf32> to vector<2x16x1xf32>
    %9 = vector.shape_cast %8 : vector<2x16x1xf32> to vector<32x1xf32>
    %cst_3 = arith.constant 2.44140625E-4 : f32
    %10 = vector.broadcast %cst_3 : f32 to vector<32x1xf32>
    %11 = arith.mulf %9, %10 : vector<32x1xf32>
    %12 = vector.broadcast %11 : vector<32x1xf32> to vector<32x256xf32>
    %13 = arith.subf %1, %12 : vector<32x256xf32>
    %14 = arith.mulf %13, %13 : vector<32x256xf32>
    %cst_4 = arith.constant dense<0.000000e+00> : vector<32xf32>
    %15 = vector.multi_reduction <add>, %14, %cst_4 [1] : vector<32x256xf32> to vector<32xf32>
    %16 = vector.shape_cast %15 : vector<32xf32> to vector<32x1xf32>
    %17 = vector.shape_cast %16 : vector<32x1xf32> to vector<2x16x1xf32>
    %cst_5 = arith.constant dense<0.000000e+00> : vector<2x1xf32>
    %18 = vector.multi_reduction <add>, %17, %cst_5 [1] : vector<2x16x1xf32> to vector<2x1xf32>
    %19 = vector.shape_cast %18 : vector<2x1xf32> to vector<2x1x1xf32>
    %20 = vector.shape_cast %19 : vector<2x1x1xf32> to vector<2x1x1xf32>
    %21 = vector.broadcast %20 : vector<2x1x1xf32> to vector<2x16x1xf32>
    %22 = vector.shape_cast %21 : vector<2x16x1xf32> to vector<32x1xf32>
    %cst_6 = arith.constant 2.44140625E-4 : f32
    %23 = vector.broadcast %cst_6 : f32 to vector<32x1xf32>
    %24 = arith.mulf %22, %23 : vector<32x1xf32>
    %cst_7 = arith.constant 9.99999974E-6 : f32
    %25 = vector.broadcast %cst_7 : f32 to vector<32x1xf32>
    %26 = arith.addf %24, %25 : vector<32x1xf32>
    %27 = math.rsqrt %26 : vector<32x1xf32>
    %c0_8 = arith.constant 0 : index
    %c0_9 = arith.constant 0 : index
    %28 = vector.load %arg2[%c0_8, %c0_9] : memref<32x1xf32, #tpu.memory_space<vmem>>, vector<32x1xf32>
    %29 = arith.mulf %27, %28 : vector<32x1xf32>
    %30 = vector.broadcast %29 : vector<32x1xf32> to vector<32x256xf32>
    %31 = arith.mulf %13, %30 : vector<32x256xf32>
    %c0_10 = arith.constant 0 : index
    %c0_11 = arith.constant 0 : index
    %32 = vector.load %arg3[%c0_10, %c0_11] : memref<32x1xf32, #tpu.memory_space<vmem>>, vector<32x1xf32>
    %33 = vector.broadcast %32 : vector<32x1xf32> to vector<32x256xf32>
    %34 = arith.addf %31, %33 : vector<32x256xf32>
    %35 = arith.negf %34 : vector<32x256xf32>
    %36 = math.exp %35 : vector<32x256xf32>
    %cst_12 = arith.constant 1.000000e+00 : f32
    %37 = vector.broadcast %cst_12 : f32 to vector<32x256xf32>
    %38 = arith.addf %37, %36 : vector<32x256xf32>
    %39 = arith.divf %37, %38 : vector<32x256xf32>
    %40 = arith.mulf %34, %39 : vector<32x256xf32>
    %c0_13 = arith.constant 0 : index
    %c0_14 = arith.constant 0 : index
    %41 = vector.load %arg4[%c0_13, %c0_14] : memref<64x32xf32, #tpu.memory_space<vmem>>, vector<64x32xf32>
    %cst_15 = arith.constant dense<0.000000e+00> : vector<64x256xf32>
    %42 = tpu.matmul %41, %40, %cst_15 {dimension_numbers = #tpu.dot_dimension_numbers<[1], [0], [0], [1], [0, 0, 1, 1], [], []>} : vector<64x32xf32>, vector<32x256xf32>, vector<64x256xf32> -> vector<64x256xf32>
    %c0_16 = arith.constant 0 : index
    %c0_17 = arith.constant 0 : index
    %43 = vector.load %arg5[%c0_16, %c0_17] : memref<64x1xf32, #tpu.memory_space<vmem>>, vector<64x1xf32>
    %44 = vector.broadcast %43 : vector<64x1xf32> to vector<64x256xf32>
    %45 = arith.addf %42, %44 : vector<64x256xf32>
    %c0_18 = arith.constant 0 : index
    %c0_19 = arith.constant 0 : index
    %c0_20 = arith.constant 0 : index
    %46 = vector.load %arg6[%c0_18, %c0_19, %c0_20] : memref<1x64x256xf32, #tpu.memory_space<vmem>>, vector<1x64x256xf32>
    %47 = vector.shape_cast %46 : vector<1x64x256xf32> to vector<64x256xf32>
    %48 = vector.shape_cast %45 : vector<64x256xf32> to vector<1x64x256xf32>
    tpu.vector_store %arg6[%c0_18, %c0_19, %c0_20], %48 {strides = array<i32>} : memref<1x64x256xf32, #tpu.memory_space<vmem>>, vector<1x64x256xf32>,
    return
  }
  func.func @transform_0(%arg0: i32) -> (i32, i32, i32) {
    %c0_i32 = arith.constant 0 : i32
    %c0_i32_0 = arith.constant 0 : i32
    %c0_i32_1 = arith.constant 0 : i32
    return %arg0, %c0_i32, %c0_i32_0 : i32, i32, i32
  }
  func.func @transform_1(%arg0: i32) -> (i32, i32) {
    %c0_i32 = arith.constant 0 : i32
    %c0_i32_0 = arith.constant 0 : i32
    %c0_i32_1 = arith.constant 0 : i32
    return %c0_i32, %c0_i32_0 : i32, i32
  }
  func.func @transform_2(%arg0: i32) -> (i32, i32) {
    %c0_i32 = arith.constant 0 : i32
    %c0_i32_0 = arith.constant 0 : i32
    %c0_i32_1 = arith.constant 0 : i32
    return %c0_i32, %c0_i32_0 : i32, i32
  }
  func.func @transform_3(%arg0: i32) -> (i32, i32) {
    %c0_i32 = arith.constant 0 : i32
    %c0_i32_0 = arith.constant 0 : i32
    %c0_i32_1 = arith.constant 0 : i32
    return %c0_i32, %c0_i32_0 : i32, i32
  }
  func.func @transform_4(%arg0: i32) -> (i32, i32) {
    %c0_i32 = arith.constant 0 : i32
    %c0_i32_0 = arith.constant 0 : i32
    %c0_i32_1 = arith.constant 0 : i32
    return %c0_i32, %c0_i32_0 : i32, i32
  }
  func.func @transform_5(%arg0: i32) -> (i32, i32, i32) {
    %c0_i32 = arith.constant 0 : i32
    %c0_i32_0 = arith.constant 0 : i32
    %c0_i32_1 = arith.constant 0 : i32
    return %arg0, %c0_i32, %c0_i32_0 : i32, i32, i32
  }
}

module attributes {stable_mosaic.version = 11 : i64} {
  func.func @_gn_stats_kernel(%arg0: i32, %arg1: i32, %arg2: i32, %arg3: memref<1x32x256xf32, #tpu.memory_space<vmem>>, %arg4: memref<1x1x32x1xf32, #tpu.memory_space<vmem>>, %arg5: memref<1x1x32x1xf32, #tpu.memory_space<vmem>>) attributes {dimension_semantics = [#tpu.dimension_semantics<parallel>, #tpu.dimension_semantics<parallel>, #tpu.dimension_semantics<arbitrary>], iteration_bounds = array<i64: 2, 1, 1>, scalar_prefetch = 0 : i64, scratch_operands = 0 : i64, tpu.core_type = #tpu.core_type<tc>, window_params = [{transform_indices = @transform_0, window_bounds = array<i64: 1, 32, 256>}, {transform_indices = @transform_1, window_bounds = array<i64: 1, 1, 32, 1>}, {transform_indices = @transform_2, window_bounds = array<i64: 1, 1, 32, 1>}]} {
    %c0_i32 = arith.constant 0 : i32
    %0 = arith.cmpi eq, %arg2, %c0_i32 : i32
    %1 = arith.extui %0 : i1 to i32
    %c0_i32_0 = arith.constant 0 : i32
    %2 = arith.cmpi ne, %1, %c0_i32_0 : i32
    scf.if %2 {
      %cst_20 = arith.constant 0.000000e+00 : f32
      %22 = vector.broadcast %cst_20 : f32 to vector<32x1xf32>
      %c0_21 = arith.constant 0 : index
      %c0_22 = arith.constant 0 : index
      %c0_23 = arith.constant 0 : index
      %c0_24 = arith.constant 0 : index
      %23 = vector.load %arg4[%c0_21, %c0_22, %c0_23, %c0_24] : memref<1x1x32x1xf32, #tpu.memory_space<vmem>>, vector<1x1x32x1xf32>
      %24 = vector.shape_cast %23 : vector<1x1x32x1xf32> to vector<32x1xf32>
      %25 = vector.shape_cast %22 : vector<32x1xf32> to vector<1x1x32x1xf32>
      tpu.vector_store %arg4[%c0_21, %c0_22, %c0_23, %c0_24], %25 {strides = array<i32>} : memref<1x1x32x1xf32, #tpu.memory_space<vmem>>, vector<1x1x32x1xf32>,
      %cst_25 = arith.constant 0.000000e+00 : f32
      %26 = vector.broadcast %cst_25 : f32 to vector<32x1xf32>
      %c0_26 = arith.constant 0 : index
      %c0_27 = arith.constant 0 : index
      %c0_28 = arith.constant 0 : index
      %c0_29 = arith.constant 0 : index
      %27 = vector.load %arg5[%c0_26, %c0_27, %c0_28, %c0_29] : memref<1x1x32x1xf32, #tpu.memory_space<vmem>>, vector<1x1x32x1xf32>
      %28 = vector.shape_cast %27 : vector<1x1x32x1xf32> to vector<32x1xf32>
      %29 = vector.shape_cast %26 : vector<32x1xf32> to vector<1x1x32x1xf32>
      tpu.vector_store %arg5[%c0_26, %c0_27, %c0_28, %c0_29], %29 {strides = array<i32>} : memref<1x1x32x1xf32, #tpu.memory_space<vmem>>, vector<1x1x32x1xf32>,
    } else {
    }
    %c0 = arith.constant 0 : index
    %c0_1 = arith.constant 0 : index
    %c0_2 = arith.constant 0 : index
    %3 = vector.load %arg3[%c0, %c0_1, %c0_2] : memref<1x32x256xf32, #tpu.memory_space<vmem>>, vector<1x32x256xf32>
    %4 = vector.shape_cast %3 : vector<1x32x256xf32> to vector<32x256xf32>
    %c0_3 = arith.constant 0 : index
    %c0_4 = arith.constant 0 : index
    %c0_5 = arith.constant 0 : index
    %c0_6 = arith.constant 0 : index
    %5 = vector.load %arg4[%c0_3, %c0_4, %c0_5, %c0_6] : memref<1x1x32x1xf32, #tpu.memory_space<vmem>>, vector<1x1x32x1xf32>
    %6 = vector.shape_cast %5 : vector<1x1x32x1xf32> to vector<32x1xf32>
    %cst = arith.constant dense<0.000000e+00> : vector<32xf32>
    %7 = vector.multi_reduction <add>, %4, %cst [1] : vector<32x256xf32> to vector<32xf32>
    %8 = vector.shape_cast %7 : vector<32xf32> to vector<32x1xf32>
    %9 = arith.addf %6, %8 : vector<32x1xf32>
    %c0_7 = arith.constant 0 : index
    %c0_8 = arith.constant 0 : index
    %c0_9 = arith.constant 0 : index
    %c0_10 = arith.constant 0 : index
    %10 = vector.load %arg4[%c0_7, %c0_8, %c0_9, %c0_10] : memref<1x1x32x1xf32, #tpu.memory_space<vmem>>, vector<1x1x32x1xf32>
    %11 = vector.shape_cast %10 : vector<1x1x32x1xf32> to vector<32x1xf32>
    %12 = vector.shape_cast %9 : vector<32x1xf32> to vector<1x1x32x1xf32>
    tpu.vector_store %arg4[%c0_7, %c0_8, %c0_9, %c0_10], %12 {strides = array<i32>} : memref<1x1x32x1xf32, #tpu.memory_space<vmem>>, vector<1x1x32x1xf32>,
    %c0_11 = arith.constant 0 : index
    %c0_12 = arith.constant 0 : index
    %c0_13 = arith.constant 0 : index
    %c0_14 = arith.constant 0 : index
    %13 = vector.load %arg5[%c0_11, %c0_12, %c0_13, %c0_14] : memref<1x1x32x1xf32, #tpu.memory_space<vmem>>, vector<1x1x32x1xf32>
    %14 = vector.shape_cast %13 : vector<1x1x32x1xf32> to vector<32x1xf32>
    %15 = arith.mulf %4, %4 : vector<32x256xf32>
    %cst_15 = arith.constant dense<0.000000e+00> : vector<32xf32>
    %16 = vector.multi_reduction <add>, %15, %cst_15 [1] : vector<32x256xf32> to vector<32xf32>
    %17 = vector.shape_cast %16 : vector<32xf32> to vector<32x1xf32>
    %18 = arith.addf %14, %17 : vector<32x1xf32>
    %c0_16 = arith.constant 0 : index
    %c0_17 = arith.constant 0 : index
    %c0_18 = arith.constant 0 : index
    %c0_19 = arith.constant 0 : index
    %19 = vector.load %arg5[%c0_16, %c0_17, %c0_18, %c0_19] : memref<1x1x32x1xf32, #tpu.memory_space<vmem>>, vector<1x1x32x1xf32>
    %20 = vector.shape_cast %19 : vector<1x1x32x1xf32> to vector<32x1xf32>
    %21 = vector.shape_cast %18 : vector<32x1xf32> to vector<1x1x32x1xf32>
    tpu.vector_store %arg5[%c0_16, %c0_17, %c0_18, %c0_19], %21 {strides = array<i32>} : memref<1x1x32x1xf32, #tpu.memory_space<vmem>>, vector<1x1x32x1xf32>,
    return
  }
  func.func @transform_0(%arg0: i32, %arg1: i32, %arg2: i32) -> (i32, i32, i32) {
    %c1_i32 = arith.constant 1 : i32
    %0 = arith.muli %arg1, %c1_i32 : i32
    %1 = arith.addi %0, %arg2 : i32
    %c0_i32 = arith.constant 0 : i32
    %c0_i32_0 = arith.constant 0 : i32
    return %arg0, %c0_i32, %1 : i32, i32, i32
  }
  func.func @transform_1(%arg0: i32, %arg1: i32, %arg2: i32) -> (i32, i32, i32, i32) {
    %c0_i32 = arith.constant 0 : i32
    %c0_i32_0 = arith.constant 0 : i32
    %c0_i32_1 = arith.constant 0 : i32
    return %arg0, %arg1, %c0_i32, %c0_i32_0 : i32, i32, i32, i32
  }
  func.func @transform_2(%arg0: i32, %arg1: i32, %arg2: i32) -> (i32, i32, i32, i32) {
    %c0_i32 = arith.constant 0 : i32
    %c0_i32_0 = arith.constant 0 : i32
    %c0_i32_1 = arith.constant 0 : i32
    return %arg0, %arg1, %c0_i32, %c0_i32_0 : i32, i32, i32, i32
  }
}

</mosaic_0001>

<bundles_post_ra>
// kernel: tpu_custom_call.1
= control target key start
LH: loop header
LB: loop body
LE: loop exit
PB: predicated region body
PF: predicated region fallthrough
CT: control target
= control target key end

     0   :  { %10 = vsyncpa [#allocation3], 0  ;;  %s1193_s0 = inlined_call_operand.vmem [shape: f32[2,32,256], index: 0, kind: input, shape index: {}]   ;;  %s1194_s1 = inlined_call_operand.vmem [shape: f32[32,1], index: 1, kind: input, shape index: {}]   ;;  %s1195_s2 = inlined_call_operand.vmem [shape: f32[32,1], index: 2, kind: input, shape index: {}]   ;;  %s1196_s3 = inlined_call_operand.vmem [shape: f32[64,32], index: 3, kind: input, shape index: {}]   ;;  %s1197_s4 = inlined_call_operand.vmem [shape: f32[64,1], index: 4, kind: input, shape index: {}]   ;;  %s1198_s5 = inlined_call_operand.hbm [shape: f32[2,64,256], index: 5, kind: output, shape index: {}]  }
   0x1   :  { %12 = vsyncpa [#allocation3 + $0x1], 0  ;;  %s939_s18 = smov 0   ;;  %s941_s19 = smov 0  }
   0x2   :  { %s943_s20 = smov 0   ;;  %s945_s21 = smov 0  }
   0x3 LB: > { %s960_s22 = sadd.s32 4294967295, %s902_s21   ;;  %s717_s23 = sadd.s32 4294967294, %s902_s21   ;;  %s902_s21 = sphi %s945_s21, %s1204_s21   ;;  %s898_s20 = sphi %s943_s20, %s1203_s20   ;;  %s894_s19 = sphi %s941_s19, %s1202_s19   ;;  %s890_s18 = sphi %s939_s18, %s1201_s18  }
   0x4   : > { %s964_s24 = sadd.s32 1, %s902_s21   ;;  %s135_s25 = sadd.s32 1, %s898_s20 }
   0x5   : > { %s132_s26 = ssub.s32 %s902_s21, %s964_s24  ;;  %p145_p0 = scmp.ne.s32.totalorder %s898_s20, %s894_s19 }
   0x6   : > { %p133_p1 = scmp.eq.s32.totalorder %s132_s26, 0  ;;  %p146_p2 = scmp.eq.s32.totalorder %s960_s22, 1 }
   0x7   : > { %p151_p3 = scmp.ne.s32.totalorder %s894_s19, %s890_s18  ;;  %p152_p4 = scmp.eq.s32.totalorder %s717_s23, 1 }
   0x8   : > { %s975_s27 = scalar_select %p133_p1, %s898_s20, %s135_s25  }
   0x9   : > { %p977_p5 = por %p146_p2, %p145_p0  ;;  %p981_p6 = por %p152_p4, %p151_p3 }
   0xa   : > { %p720_p7 = scmp.ge.s32.totalorder %s902_s21, 1  ;;  %p190_p8 = scmp.lt.s32.totalorder %s902_s21, 3 }
   0xc   : > { %p191_p9 = pnand %p720_p7, %p190_p8 }
   0xd   : > { %p218_p10 = scmp.lt.s32.totalorder (!%p191_p9), %s960_s22, 1  ;;  %v904_v52 = vmov (!%p191_p9), 0   ;;  %v343_v53 = vld [vmem:[%s1195_s2] sm:$0xff] (!%p191_p9)  ;;  %v344_v54 = vld [vmem:[%s1195_s2 + $0x8] sm:$0xff] (!%p191_p9)  ;;  %v345_v55 = vld [vmem:[%s1195_s2 + $0x10] sm:$0xff] (!%p191_p9)  ;;  %vm487_vm0 = vcmask (!%p191_p9), 261120  }
   0xe   : > { %194 = sbr.rel (%p191_p9) target bundleno = 789 (0x315), region = 40  ;;  %803 = vset.pattern.permute.xlu1 (!%p191_p9), %v904_v52  ;;  %802 = vset.pattern.permute.xlu0 (!%p191_p9), %v904_v52  ;;  %s215_s10 = sand.u32 (!%p191_p9), 1, %s894_s19  }
   0xf   : > { %s721_s11 = sshll.u32 (!%p191_p9), %s215_s10, 7  ;;  %s746_s13 = sshll.u32 (!%p191_p9), %s960_s22, 11 }
  0x10   : > { %s1123_s12 = scalar_lea.vmem (!%p191_p9), [#allocation2], %s721_s11  ;;  %s1142_s16 = scalar_lea.hbm (!%p191_p9), %s1198_s5, %s746_s13 }
  0x11   : > { %s655_s14 = sshll.u32 (!%p191_p9), %s1123_s12, 4  ;;  %s1152_s17 = scalar_lea.sflag (!%p191_p9), [#allocation3], %s215_s10  ;;  %s1144_s14 = int_to_ptr.vmem [resolvable:$true] %s655_s14 }
  0x12   : > { %s840_s23 = scalar_lea.vmem (!%p191_p9), %s1144_s14, 2048  ;;  %s906_s25 = smov (!%p191_p9), [#allocation2]  }
  0x13   : > { %p841_p11 = scmp.ne.s32.totalorder (!%p191_p9), %s1144_s14, %s840_s23  ;;  %s844_s26 = sshll.u32 (!%p191_p9), %s906_s25, 4  ;;  %s845_s26 = int_to_ptr.vmem [resolvable:$false] %s844_s26 }
  0x14   : > { %p847_p0 = scmp.lt.s32.totalorder (!%p191_p9), %s1144_s14, %s845_s26 }
  0x15   : > { %s219_s30 = scalar_select %p218_p10, %s960_s22, 1 }
  0x16   : > { %p842_p12 = pnand %p841_p11, %p977_p5 }
  0x17   : > { %s745_s6 = sshll.u32 %s219_s30, 6  ;;  %s846_s30 = scalar_lea.vmem %s845_s26, 4096 }
  0x18   : > { %s222_s9 = scalar_lea.vmem %s1193_s0, %s745_s6  ;;  %p843_p13 = pneg %p842_p12 }
  0x19   : > { %v227_v0 = vld [vmem:[%s222_s9 + $0x20] sm:$0xff]  ;;  %v228_v1 = vld [vmem:[%s222_s9 + $0x28] sm:$0xff]  ;;  %v229_v5 = vld [vmem:[%s222_s9 + $0x30] sm:$0xff]  ;;  %p848_p1 = scmp.lt.s32.totalorder %s846_s30, %s840_s23 }
  0x1a   : > { %v223_v2 = vld [vmem:[%s222_s9] sm:$0xff]  ;;  %v237_v3 = vadd.f32 %v228_v1, %v227_v0  ;;  %v224_v4 = vld [vmem:[%s222_s9 + $0x8] sm:$0xff]  ;;  %v230_v6 = vld [vmem:[%s222_s9 + $0x38] sm:$0xff] }
  0x1b   : > { %v231_v7 = vadd.f32 %v224_v4, %v223_v2  ;;  %v225_v8 = vld [vmem:[%s222_s9 + $0x10] sm:$0xff]  ;;  %v226_v9 = vld [vmem:[%s222_s9 + $0x18] sm:$0xff]  ;;  %v240_v10 = vadd.f32 %v230_v6, %v229_v5  ;;  %p849_p2 = por %p848_p1, %p847_p0 }
  0x1c   : > { %238 = vadd.xlane.f32.xlu1 %v237_v3  ;;  %v234_v11 = vadd.f32 %v226_v9, %v225_v8 }
  0x1d   : > { %232 = vadd.xlane.f32.xlu0 %v231_v7  ;;  %p850_p3 = pnand %p849_p2, %p843_p13 }
  0x20   : > { %241 = vadd.xlane.f32.xlu1 %v240_v10 }
  0x21   : > { %235 = vadd.xlane.f32.xlu0 %v234_v11 }
  0xa9   : > { %v239_v12 = vpop.xlane.xlu1 %238 }
  0xaa   : > { %v233_v13 = vpop.xlane.xlu0 %232 }
  0xad   : > { %v242_v14 = vpop.xlane.xlu1 %241 }
  0xae   : > { %v250_v15 = vadd.f32 %v242_v14, %v239_v12  ;;  %v236_v16 = vpop.xlane.xlu0 %235  ;;  %v308_v14 = vld [vmem:[%s1194_s1 + $0x8] sm:$0xff] }
  0xaf   : > { %v243_v17 = vadd.f32 %v236_v16, %v233_v13 }
  0xb0   : > { %v251_v18 = vrot.slane %v250_v15, 4 }
  0xb1   : > { %v244_v19 = vrot.slane %v243_v17, 4 }
  0xb2   : > { %v252_v20 = vadd.f32 %v251_v18, %v250_v15  ;;  %v307_v15 = vld [vmem:[%s1194_s1] sm:$0xff] }
  0xb3   : > { %v245_v21 = vadd.f32 %v244_v19, %v243_v17  ;;  %v309_v19 = vld [vmem:[%s1194_s1 + $0x10] sm:$0xff] }
  0xb4   : > { %v253_v22 = vrot.slane %v252_v20, 2 }
  0xb5   : > { %v246_v23 = vrot.slane %v245_v21, 2 }
  0xb6   : > { %v254_v24 = vadd.f32 %v253_v22, %v252_v20 }
  0xb7   : > { %v247_v25 = vadd.f32 %v246_v23, %v245_v21  ;;  %v440_v21 = vld [vmem:[%s1197_s4 + $0x8] sm:$0xff]  ;;  %v310_v23 = vld [vmem:[%s1194_s1 + $0x18] sm:$0xff] }
  0xb8   : > { %v255_v26 = vrot.slane %v254_v24, 1 }
  0xb9   : > { %v248_v27 = vrot.slane %v247_v25, 1 }
  0xba   : > { %v256_v28 = vadd.f32 %v255_v26, %v254_v24  ;;  %v442_v24 = vld [vmem:[%s1197_s4 + $0x18] sm:$0xff]  ;;  %v444_v26 = vld [vmem:[%s1197_s4 + $0x28] sm:$0xff] }
  0xbb   : > { %v249_v29 = vadd.f32 %v248_v27, %v247_v25  ;;  %v346_v27 = vld [vmem:[%s1195_s2 + $0x18] sm:$0xff] }
  0xbc   : > { %v258_v30 = vmul.f32 0.00024414063, %v256_v28  ;;  %v446_v28 = vld [vmem:[%s1197_s4 + $0x38] sm:$0xff] }
  0xbd   : > { %v257_v31 = vmul.f32 0.00024414063, %v249_v29  ;;  %v439_v29 = vld [vmem:[%s1197_s4] sm:$0xff] }
  0xbe   : > { %v992_v32 = vsub.f32 %v229_v5, %v258_v30  ;;  %v994_v33 = vsub.f32 %v230_v6, %v258_v30  ;;  %v996_v34 = vsub.f32 %v227_v0, %v258_v30  ;;  %v998_v35 = vsub.f32 %v228_v1, %v258_v30  ;;  %v441_v30 = vld [vmem:[%s1197_s4 + $0x10] sm:$0xff] }
  0xbf   : > { %v1000_v36 = vsub.f32 %v225_v8, %v257_v31  ;;  %v1002_v37 = vsub.f32 %v226_v9, %v257_v31  ;;  %v1004_v38 = vsub.f32 %v223_v2, %v257_v31  ;;  %v1006_v39 = vsub.f32 %v224_v4, %v257_v31  ;;  %v443_v31 = vld [vmem:[%s1197_s4 + $0x20] sm:$0xff] }
  0xc0   : > { %v273_v44 = vmul.f32 %v992_v32, %v992_v32  ;;  %v274_v45 = vmul.f32 %v994_v33, %v994_v33  ;;  %v271_v48 = vmul.f32 %v996_v34, %v996_v34  ;;  %v272_v49 = vmul.f32 %v998_v35, %v998_v35 }
  0xc1   : > { %v269_v40 = vmul.f32 %v1000_v36, %v1000_v36  ;;  %v270_v41 = vmul.f32 %v1002_v37, %v1002_v37  ;;  %v267_v42 = vmul.f32 %v1004_v38, %v1004_v38  ;;  %v268_v43 = vmul.f32 %v1006_v39, %v1006_v39 }
  0xc2   : > { %v284_v50 = vadd.f32 %v274_v45, %v273_v44  ;;  %v281_v51 = vadd.f32 %v272_v49, %v271_v48 }
  0xc3   : > { %v278_v46 = vadd.f32 %v270_v41, %v269_v40  ;;  %v275_v47 = vadd.f32 %v268_v43, %v267_v42  ;;  %v445_v40 = vld [vmem:[%s1197_s4 + $0x30] sm:$0xff]  ;;  %v905_v41 = vmov 0.0  }
  0xc4   : > { %576 = vmatprep.mubr.f32.mxu0 %v905_v41  ;;  %600 = vmatprep.mubr.f32.mxu1 %v905_v41 }
  0xc5   : > { %279 = vadd.xlane.f32.xlu1 %v278_v46  ;;  %276 = vadd.xlane.f32.xlu0 %v275_v47 }
  0xc9   : > { %285 = vadd.xlane.f32.xlu1 %v284_v50  ;;  %282 = vadd.xlane.f32.xlu0 %v281_v51 }
  0xda   : > { %349 = vperm.xlu1 %803, %v343_v53  }
  0xde   : > { %354 = vperm.xlu1 %803, %v344_v54  }
  0xe2   : > { %359 = vperm.xlu1 %803, %v345_v55  }
 0x152   : > { %v280_v56 = vpop.xlane.xlu1 %279  ;;  %v277_v57 = vpop.xlane.xlu0 %276 }
 0x153   : > { %v287_v58 = vadd.f32 %v280_v56, %v277_v57 }
 0x155   : > { %v288_v59 = vrot.slane %v287_v58, 4 }
 0x156   : > { %v286_v60 = vpop.xlane.xlu1 %285  ;;  %v283_v61 = vpop.xlane.xlu0 %282 }
 0x157   : > { %v289_v62 = vadd.f32 %v288_v59, %v287_v58  ;;  %v294_v63 = vadd.f32 %v286_v60, %v283_v61 }
 0x159   : > { %v290_v0 = vrot.slane %v289_v62, 2  ;;  %v295_v1 = vrot.slane %v294_v63, 4 }
 0x15a   : > { %v350_v42 = vpop.permute.xlu1 %349 }
 0x15b   : > { %v291_v2 = vadd.f32 %v290_v0, %v289_v62  ;;  %v296_v3 = vadd.f32 %v295_v1, %v294_v63 }
 0x15d   : > { %v292_v4 = vrot.slane %v291_v2, 1  ;;  %v297_v5 = vrot.slane %v296_v3, 2 }
 0x15e   : > { %v355_v43 = vpop.permute.xlu1 %354 }
 0x15f   : > { %v293_v6 = vadd.f32 %v292_v4, %v291_v2  ;;  %v298_v7 = vadd.f32 %v297_v5, %v296_v3 }
 0x161   : > { %v301_v8 = vmul.f32 0.00024414063, %v293_v6  ;;  %v299_v9 = vrot.slane %v298_v7, 1 }
 0x162   : > { %v360_v44 = vpop.permute.xlu1 %359 }
 0x163   : > { %v303_v10 = vadd.f32 1e-05, %v301_v8  ;;  %v300_v11 = vadd.f32 %v299_v9, %v298_v7 }
 0x165   : > { %804 = vrsqrt.f32 %v303_v10  ;;  %v302_v12 = vmul.f32 0.00024414063, %v300_v11 }
 0x167   : > { %v304_v13 = vadd.f32 1e-05, %v302_v12 }
 0x169   : > { %806 = vrsqrt.f32 %v304_v13 }
 0x16f   : > { %v805_v16 = vpop.eup %804 }
 0x170   : > { %v312_v17 = vmul.f32 %v805_v16, %v308_v14  ;;  %v311_v18 = vmul.f32 %v805_v16, %v307_v15 }
 0x172   : > { %322 = vperm.xlu1 %803, %v312_v17   ;;  %317 = vperm.xlu0 %802, %v311_v18  }
 0x173   : > { %v807_v20 = vpop.eup %806 }
 0x174   : > { %v313_v22 = vmul.f32 %v807_v20, %v309_v19  ;;  %v314_v25 = vmul.f32 %v807_v20, %v310_v23 }
 0x176   : > { %454 = vperm.xlu0 %802, %v440_v21   ;;  %327 = vperm.xlu1 %803, %v313_v22  }
 0x17a   : > { %464 = vperm.xlu0 %802, %v442_v24   ;;  %332 = vperm.xlu1 %803, %v314_v25  }
 0x17e   : > { %474 = vperm.xlu0 %802, %v444_v26   ;;  %364 = vperm.xlu1 %803, %v346_v27  }
 0x182   : > { %484 = vperm.xlu0 %802, %v446_v28   ;;  %449 = vperm.xlu1 %803, %v439_v29  }
 0x186   : > { %459 = vperm.xlu1 %803, %v441_v30  }
 0x18a   : > { %469 = vperm.xlu1 %803, %v443_v31  }
 0x18e   : > { %479 = vperm.xlu1 %803, %v445_v40  }
 0x1f1   : > { %v323_v45 = vpop.permute.xlu1 %322  ;;  %v318_v46 = vpop.permute.xlu0 %317 }
 0x1f2   : > { %v337_v47 = vmul.f32 %v323_v45, %v1000_v36  ;;  %v338_v48 = vmul.f32 %v323_v45, %v1002_v37  ;;  %v335_v49 = vmul.f32 %v318_v46, %v1004_v38  ;;  %v336_v50 = vmul.f32 %v318_v46, %v1006_v39 }
 0x1f4   : > { %v369_v51 = vadd.f32 %v355_v43, %v337_v47  ;;  %v370_v52 = vadd.f32 %v355_v43, %v338_v48  ;;  %v367_v53 = vadd.f32 %v350_v42, %v335_v49  ;;  %v368_v54 = vadd.f32 %v350_v42, %v336_v50  ;;  %v431_v47 = vld [vmem:[%s1196_s3] sm:$0xff]  ;;  %v432_v49 = vld [vmem:[%s1196_s3 + $0x8] sm:$0xff] }
 0x1f5   : > { %v328_v55 = vpop.permute.xlu1 %327  ;;  %v435_v48 = vld [vmem:[%s1196_s3 + $0x20] sm:$0xff]  ;;  %v436_v50 = vld [vmem:[%s1196_s3 + $0x28] sm:$0xff] }
 0x1f6   : > { %v726_v56 = vmul.f32 -1.442695, %v369_v51  ;;  %v727_v57 = vmul.f32 -1.442695, %v370_v52  ;;  %v724_v58 = vmul.f32 -1.442695, %v367_v53  ;;  %v339_v59 = vmul.f32 %v328_v55, %v996_v34 }
 0x1f7   : > { %v725_v60 = vmul.f32 -1.442695, %v368_v54  ;;  %v340_v61 = vmul.f32 %v328_v55, %v998_v35 }
 0x1f8   : > { %808 = vpow2.f32 %v726_v56  ;;  %v371_v36 = vadd.f32 %v360_v44, %v339_v59  ;;  %v455_v56 = vpop.permute.xlu0 %454 }
 0x1f9   : > { %810 = vpow2.f32 %v727_v57  ;;  %v372_v37 = vadd.f32 %v360_v44, %v340_v61  ;;  %v333_v38 = vpop.permute.xlu1 %332 }
 0x1fa   : > { %812 = vpow2.f32 %v724_v58  ;;  %v728_v39 = vmul.f32 -1.442695, %v371_v36  ;;  %v341_v63 = vmul.f32 %v333_v38, %v992_v32  ;;  %v342_v0 = vmul.f32 %v333_v38, %v994_v33 }
 0x1fb   : > { %814 = vpow2.f32 %v725_v60  ;;  %v729_v62 = vmul.f32 -1.442695, %v372_v37 }
 0x1fc   : > { %816 = vpow2.f32 %v728_v39  ;;  %v465_v58 = vpop.permute.xlu0 %464 }
 0x1fd   : > { %818 = vpow2.f32 %v729_v62  ;;  %v365_v1 = vpop.permute.xlu1 %364 }
 0x1fe   : > { %v373_v34 = vadd.f32 %v365_v1, %v341_v63  ;;  %v374_v2 = vadd.f32 %v365_v1, %v342_v0 }
 0x200   : > { %v730_v3 = vmul.f32 -1.442695, %v373_v34  ;;  %v731_v35 = vmul.f32 -1.442695, %v374_v2  ;;  %v475_v63 = vpop.permute.xlu0 %474 }
 0x201   : > { %v450_v55 = vpop.permute.xlu1 %449 }
 0x202   : > { %v809_v4 = vpop.eup %808  ;;  %820 = vpow2.f32 %v730_v3 }
 0x203   : > { %v811_v5 = vpop.eup %810  ;;  %v401_v6 = vadd.f32 1.0, %v809_v4  ;;  %822 = vpow2.f32 %v731_v35 }
 0x204   : > { %v813_v7 = vpop.eup %812  ;;  %v402_v8 = vadd.f32 1.0, %v811_v5 }
 0x205   : > { %v815_v9 = vpop.eup %814  ;;  %824 = vrcp.f32 %v401_v6  ;;  %v399_v10 = vadd.f32 1.0, %v813_v7  ;;  %v460_v57 = vpop.permute.xlu1 %459 }
 0x206   : > { %v817_v11 = vpop.eup %816  ;;  %826 = vrcp.f32 %v402_v8  ;;  %v400_v32 = vadd.f32 1.0, %v815_v9 }
 0x207   : > { %v819_v33 = vpop.eup %818  ;;  %828 = vrcp.f32 %v399_v10  ;;  %v403_v12 = vadd.f32 1.0, %v817_v11 }
 0x208   : > { %830 = vrcp.f32 %v400_v32  ;;  %v404_v13 = vadd.f32 1.0, %v819_v33 }
 0x209   : > { %832 = vrcp.f32 %v403_v12 }
 0x20a   : > { %834 = vrcp.f32 %v404_v13  ;;  %v485_v13 = vpop.permute.xlu0 %484 }
 0x20c   : > { %v821_v14 = vpop.eup %820 }
 0x20d   : > { %v823_v15 = vpop.eup %822  ;;  %v405_v16 = vadd.f32 1.0, %v821_v14 }
 0x20e   : > { %v406_v17 = vadd.f32 1.0, %v823_v15 }
 0x20f   : > { %v825_v18 = vpop.eup %824  ;;  %836 = vrcp.f32 %v405_v16 }
 0x210   : > { %v827_v19 = vpop.eup %826  ;;  %838 = vrcp.f32 %v406_v17  ;;  %v425_v20 = vmul.f32 %v825_v18, %v369_v51  ;;  %v433_v51 = vld [vmem:[%s1196_s3 + $0x10] sm:$0xff] }
 0x211   : > { %v829_v21 = vpop.eup %828  ;;  %v426_v22 = vmul.f32 %v827_v19, %v370_v52  ;;  %v437_v52 = vld [vmem:[%s1196_s3 + $0x30] sm:$0xff] }
 0x212   : > { %v831_v23 = vpop.eup %830  ;;  %v423_v24 = vmul.f32 %v829_v21, %v367_v53  ;;  %v434_v53 = vld [vmem:[%s1196_s3 + $0x18] sm:$0xff] }
 0x213   : > { %v424_v25 = vmul.f32 %v831_v23, %v368_v54  ;;  %v833_v28 = vpop.eup %832  ;;  %v438_v54 = vld [vmem:[%s1196_s3 + $0x38] sm:$0xff] }
 0x214   : > { %v749_v26 = vpack.c.bf16 %v425_v20, %v423_v24  ;;  %v835_v29 = vpop.eup %834  ;;  %v427_v40 = vmul.f32 %v833_v28, %v371_v36 }
 0x215   : > { %v747_v27 = vpack.c.bf16 %v426_v22, %v424_v25  ;;  %v428_v43 = vmul.f32 %v835_v29, %v372_v37 }
 0x217   : > { %748 = vmatprep.subr.bf16.mxu0 %v747_v27  ;;  %755 = vmatprep.subr.bf16.mxu1 %v747_v27 }
 0x218   : > { %750 = vmatpush1.bf16.msra.mxu0 %v749_v26  ;;  %757 = vmatpush1.bf16.msra.mxu1 %v749_v26 }
 0x219   : > { %v837_v30 = vpop.eup %836 }
 0x21a   : > { %v839_v31 = vpop.eup %838  ;;  %v429_v42 = vmul.f32 %v837_v30, %v373_v34 }
 0x21b   : > { %v430_v44 = vmul.f32 %v839_v31, %v374_v2 }
 0x21c   : > { %v753_v45 = vpack.c.bf16 %v429_v42, %v427_v40 }
 0x21d   : > { %v751_v46 = vpack.c.bf16 %v430_v44, %v428_v43 }
 0x21f   : > { %752 = vmatprep.subr.bf16.mxu0 %v751_v46  ;;  %756 = vmatprep.subr.bf16.mxu1 %v751_v46 }
 0x220   : > { %754 = vmatpush1.bf16.msra.mxu0 %v753_v45  ;;  %758 = vmatpush1.bf16.msra.mxu1 %v753_v45 }
 0x223   : > { %732 = vmatmul.mubr.msk.f32.vlgmr.msra.gmra.mrb[0].mxu0 %vm487_vm0, %v431_v47  ;;  %736 = vmatmul.mubr.msk.f32.vlgmr.msra.gmra.mrb[0].mxu1 %vm487_vm0, %v435_v48 }
 0x224   : > { %582 = vmatprep.mubr.f32.mxu0 %v905_v41  ;;  %606 = vmatprep.mubr.f32.mxu1 %v905_v41 }
 0x227   : > { %733 = vmatmul.mubr.msk.f32.gmra.mrb[2].mxu0 %vm487_vm0, %v432_v49  ;;  %737 = vmatmul.mubr.msk.f32.gmra.mrb[2].mxu1 %vm487_vm0, %v436_v50 }
 0x228   : > { %588 = vmatprep.mubr.f32.mxu0 %v905_v41  ;;  %612 = vmatprep.mubr.f32.mxu1 %v905_v41 }
 0x22b   : > { %734 = vmatmul.mubr.msk.f32.gmra.mrb[4].mxu0 %vm487_vm0, %v433_v51  ;;  %738 = vmatmul.mubr.msk.f32.gmra.mrb[4].mxu1 %vm487_vm0, %v437_v52 }
 0x22c   : > { %594 = vmatprep.mubr.f32.mxu0 %v905_v41  ;;  %618 = vmatprep.mubr.f32.mxu1 %v905_v41  ;;  %v470_v41 = vpop.permute.xlu1 %469 }
 0x22f   : > { %735 = vmatmul.mubr.msk.f32.gmra.mrb[6].mxu0 %vm487_vm0, %v434_v53  ;;  %739 = vmatmul.mubr.msk.f32.gmra.mrb[6].mxu1 %vm487_vm0, %v438_v54 }
 0x230   : > { %v480_v6 = vpop.permute.xlu1 %479 }
 0x2f6   : > { %v578_v59 = vpop.f32.mrb[0].mxu0  ;;  %v602_v60 = vpop.f32.mrb[0].mxu1 }
 0x2f7   : > { %v579_v61 = vadd.f32 %v578_v59, %v450_v55  ;;  %v603_v36 = vadd.f32 %v602_v60, %v470_v41  ;;  %v580_v37 = vpop.f32.mrb[1].mxu0  ;;  %v604_v38 = vpop.f32.mrb[1].mxu1 }
 0x2f8   : > { %v581_v39 = vadd.f32 %v580_v37, %v450_v55  ;;  %v605_v62 = vadd.f32 %v604_v38, %v470_v41 }
 0x2f9   : > { %625 = vst [vmem:[%s1123_s12] sm:$0xff] %v579_v61  ;;  %633 = vst [vmem:[%s1123_s12 + $0x40] sm:$0xff] %v603_v36 }
 0x2fa   : > { %626 = vst [vmem:[%s1123_s12 + $0x8] sm:$0xff] %v581_v39  ;;  %634 = vst [vmem:[%s1123_s12 + $0x48] sm:$0xff] %v605_v62  ;;  %v584_v0 = vpop.f32.mrb[2].mxu0  ;;  %v608_v1 = vpop.f32.mrb[2].mxu1 }
 0x2fb   : > { %v585_v34 = vadd.f32 %v584_v0, %v455_v56  ;;  %v609_v2 = vadd.f32 %v608_v1, %v475_v63  ;;  %v586_v3 = vpop.f32.mrb[3].mxu0  ;;  %v610_v35 = vpop.f32.mrb[3].mxu1 }
 0x2fc   : > { %v587_v4 = vadd.f32 %v586_v3, %v455_v56  ;;  %v611_v5 = vadd.f32 %v610_v35, %v475_v63 }
 0x2fd   : > { %627 = vst [vmem:[%s1123_s12 + $0x10] sm:$0xff] %v585_v34  ;;  %635 = vst [vmem:[%s1123_s12 + $0x50] sm:$0xff] %v609_v2 }
 0x2fe   : > { %628 = vst [vmem:[%s1123_s12 + $0x18] sm:$0xff] %v587_v4  ;;  %636 = vst [vmem:[%s1123_s12 + $0x58] sm:$0xff] %v611_v5  ;;  %v590_v7 = vpop.f32.mrb[4].mxu0  ;;  %v614_v8 = vpop.f32.mrb[4].mxu1 }
 0x2ff   : > { %v591_v9 = vadd.f32 %v590_v7, %v460_v57  ;;  %v615_v10 = vadd.f32 %v614_v8, %v480_v6  ;;  %v592_v11 = vpop.f32.mrb[5].mxu0  ;;  %v616_v32 = vpop.f32.mrb[5].mxu1 }
 0x300   : > { %v593_v33 = vadd.f32 %v592_v11, %v460_v57  ;;  %v617_v12 = vadd.f32 %v616_v32, %v480_v6 }
 0x301   : > { %629 = vst [vmem:[%s1123_s12 + $0x20] sm:$0xff] %v591_v9  ;;  %637 = vst [vmem:[%s1123_s12 + $0x60] sm:$0xff] %v615_v10 }
 0x302   : > { %630 = vst [vmem:[%s1123_s12 + $0x28] sm:$0xff] %v593_v33  ;;  %638 = vst [vmem:[%s1123_s12 + $0x68] sm:$0xff] %v617_v12  ;;  %v596_v14 = vpop.f32.mrb[6].mxu0  ;;  %v620_v15 = vpop.f32.mrb[6].mxu1 }
 0x303   : > { %v597_v16 = vadd.f32 %v596_v14, %v465_v58  ;;  %v621_v17 = vadd.f32 %v620_v15, %v485_v13  ;;  %v598_v18 = vpop.f32.mrb[7].mxu0  ;;  %v622_v19 = vpop.f32.mrb[7].mxu1 }
 0x304   : > { %v599_v20 = vadd.f32 %v598_v18, %v465_v58  ;;  %v623_v21 = vadd.f32 %v622_v19, %v485_v13 }
 0x305   : > { %631 = vst [vmem:[%s1123_s12 + $0x30] sm:$0xff] %v597_v16  ;;  %639 = vst [vmem:[%s1123_s12 + $0x70] sm:$0xff] %v621_v17 }
 0x306   : > { %632 = vst [vmem:[%s1123_s12 + $0x38] sm:$0xff] %v599_v20  ;;  %640 = vst [vmem:[%s1123_s12 + $0x78] sm:$0xff] %v623_v21 }
 0x307   : > { %853 = shalt.err (!%p850_p3)
}
 0x308   : > { %s854_s6 = scalar_lea.hbm %s1142_s16, 2048  ;;  %s858_s9 = scalar_lea.hbm %s1198_s5, 4096 }
 0x309   : > { %p855_p4 = scmp.ne.s32.totalorder %s1142_s16, %s854_s6  ;;  %p859_p9 = scmp.lt.u32.totalorder %s1142_s16, %s1198_s5 }
 0x30a   : > { %p860_p10 = scmp.lt.u32.totalorder %s858_s9, %s854_s6  ;;  %p862_p12 = scmp.lt.u32.totalorder %s854_s6, %s1142_s16 }
 0x30b   : > { %p856_p7 = pnand %p855_p4, %p977_p5 }
 0x30c   : > { %p861_p11 = por %p860_p10, %p859_p9 }
 0x30d   : > { %p857_p8 = pneg %p856_p7 }
 0x30e   : > { %p863_p13 = por %p862_p12, %p861_p11 }
 0x310   : > { %p864_p0 = pnand %p863_p13, %p857_p8 }
 0x312   : > { %867 = shalt.err (!%p864_p0)
}
 0x313   : > { %s907_s12 = smov 256   ;;  %s908_s13 = smov 16  }
 0x314   : > { %759 = dma.vmem_to_hbm [thread:$0]  (%p977_p5), %s1144_s14, 2048, %s1142_s16, %s1152_s17, %s907_s12, %s907_s12, %s908_s13  }
 0x315 PF: > { %p765_p1 = scmp.ge.s32.totalorder %s902_s21, 2  ;;  %s670_s15 = sand.u32 1, %s890_s18  }
 0x316   : > { %s671_s22 = scalar_lea.sflag [#allocation3], %s670_s15 }
 0x317   : > { %p762_p2 = pnand %p765_p1, %p981_p6 }
 0x319   : > { %885 = dma.done.wait (!%p762_p2), %s671_s22, 2048  }
 0x31a   : > { %887 = vsyncadd (!%p762_p2), %s671_s22, 4294965248  ;;  %p15_p3 = scmp.ge.s32.totalorder %s964_s24, 4   ;;  %s1201_s18 = smov %s894_s19 }
 0x31b   : > { %s1202_s19 = smov %s898_s20  ;;  %s1203_s20 = smov %s975_s27 }
 0x31c   : > { %s1204_s21 = smov %s964_s24  ;;  %17 = sbr.rel (!%p15_p3) target bundleno = 3 (0x3), region = 75 }
 0x323   :  { %676 = vsyncpa [#allocation3], 1 }
 0x324   :  { %678 = vsyncpa [#allocation3 + $0x1], 1 }

// kernel: tpu_custom_call.1
= control target key start
LH: loop header
LB: loop body
LE: loop exit
PB: predicated region body
PF: predicated region fallthrough
CT: control target
= control target key end

     0   :  { %8 = vsyncpa [#allocation3], 0  ;;  %s813_s0 = inlined_call_operand.hbm [shape: f32[2,32,256], index: 0, kind: input, shape index: {}]   ;;  %s814_s1 = inlined_call_operand.vmem [shape: f32[2,1,32,1], index: 1, kind: output, shape index: {0}]   ;;  %s815_s2 = inlined_call_operand.vmem [shape: f32[2,1,32,1], index: 2, kind: output, shape index: {1}]  }
   0x1   :  { %10 = vsyncpa [#allocation3 + $0x1], 0  ;;  %s635_s9 = smov 0   ;;  %s637_s10 = smov 0  }
   0x2   :  { %s639_s11 = smov 0   ;;  %s641_s12 = smov 0  }
   0x3   :  { %s643_s13 = smov 0   ;;  %s645_s14 = smov 0  }
   0x4 LB: > { %s458_s15 = sadd.s32 4294967295, %s614_s14   ;;  %s35_s16 = sadd.s32 1, %s610_s13  ;;  %s614_s14 = sphi %s645_s14, %s16_s14   ;;  %s610_s13 = sphi %s643_s13, %s823_s13   ;;  %s606_s12 = sphi %s641_s12, %s822_s12   ;;  %s602_s11 = sphi %s639_s11, %s821_s11   ;;  %s598_s10 = sphi %s637_s10, %s820_s10   ;;  %s594_s9 = sphi %s635_s9, %s819_s9  }
   0x5   : > { %p37_p0 = scmp.ge.s32.totalorder %s35_s16, 2  ;;  %s46_s17 = sadd.s32 1, %s602_s11 }
   0x6   : > { %p53_p1 = scmp.ne.s32.totalorder %s602_s11, %s598_s10  ;;  %p54_p2 = scmp.eq.s32.totalorder %s614_s14, 0 }
   0x7   : > { %s825_s16 = smov (%p37_p0, %s35_s16), 0  ;;  %p59_p4 = scmp.ne.s32.totalorder %s598_s10, %s594_s9 }
   0x8   : > { %p671_p3 = por %p54_p2, %p53_p1  ;;  %s41_s19 = ssub.s32 %s610_s13, %s825_s16 }
   0x9   : > { %p60_p5 = scmp.eq.s32.totalorder %s458_s15, 0  ;;  %p44_p6 = scmp.eq.s32.totalorder %s41_s19, 0 }
   0xa   : > { %p482_p8 = scmp.lt.s32.totalorder %s614_s14, 2  ;;  %s139_s22 = sand.u32 1, %s602_s11  }
   0xb   : > { %p678_p7 = por %p60_p5, %p59_p4  ;;  %s473_s23 = sshll.u32 %s610_s13, 10 }
   0xc   : > { %s684_s21 = scalar_select %p44_p6, %s602_s11, %s46_s17  }
   0xd   : > { %s462_s24 = sshll.u32 %s139_s22, 6  ;;  %s691_s27 = scalar_lea.hbm %s813_s0, %s473_s23 }
   0xe   : > { %s143_s28 = scalar_lea.vmem [#allocation2], %s462_s24  ;;  %p695_p9 = pnand %p482_p8, %p671_p3 }
   0xf   : > { %s153_s29 = sshll.u32 %s143_s28, 4  ;;  %s701_s3 = scalar_lea.sflag [#allocation3], %s139_s22  ;;  %s699_s29 = int_to_ptr.vmem [resolvable:$true] %s153_s29 }
  0x10   : > { %s534_s4 = scalar_lea.hbm %s691_s27, 1024  ;;  %p536_p11 = pneg %p695_p9 }
  0x11   : > { %p535_p10 = scmp.ne.s32.totalorder %s691_s27, %s534_s4  ;;  %s539_s7 = scalar_lea.hbm %s813_s0, 2048 }
  0x12   : > { %p540_p0 = scmp.lt.u32.totalorder %s691_s27, %s813_s0  ;;  %p541_p1 = scmp.lt.u32.totalorder %s539_s7, %s534_s4 }
  0x13   : > { %p537_p12 = pnand %p536_p11, %p535_p10  ;;  %p543_p3 = scmp.lt.u32.totalorder %s534_s4, %s691_s27 }
  0x14   : > { %p542_p2 = por %p541_p1, %p540_p0 }
  0x15   : > { %p538_p13 = pneg %p537_p12 }
  0x16   : > { %p544_p4 = por %p543_p3, %p542_p2 }
  0x18   : > { %p545_p5 = pnand %p544_p4, %p538_p13 }
  0x1a   : > { %548 = shalt.err (!%p545_p5)
}
  0x1b   : > { %s549_s15 = scalar_lea.vmem %s699_s29, 1024  ;;  %s616_s17 = smov [#allocation2]  }
  0x1c   : > { %p550_p6 = scmp.ne.s32.totalorder %s699_s29, %s549_s15  ;;  %s554_s18 = sshll.u32 %s616_s17, 4  ;;  %s555_s18 = int_to_ptr.vmem [resolvable:$false] %s554_s18 }
  0x1d   : > { %s556_s19 = scalar_lea.vmem %s555_s18, 2048  ;;  %p557_p12 = scmp.lt.s32.totalorder %s699_s29, %s555_s18 }
  0x1e   : > { %p552_p8 = pnand %p550_p6, %p536_p11  ;;  %p558_p0 = scmp.lt.s32.totalorder %s556_s19, %s549_s15 }
  0x20   : > { %p553_p10 = pneg %p552_p8  ;;  %p559_p1 = por %p558_p0, %p557_p12 }
  0x22   : > { %p560_p2 = pnand %p559_p1, %p553_p10 }
  0x24   : > { %563 = shalt.err (!%p560_p2)
}
  0x25   : > { %s617_s22 = smov 256   ;;  %s618_s23 = smov 16  }
  0x26   : > { %481 = dma.hbm_to_vmem [thread:$0]  (!%p695_p9), %s691_s27, 1024, %s699_s29, %s701_s3, %s617_s22, %s617_s22, %s618_s23  }
  0x27   : > { %p465_p11 = scmp.ge.s32.totalorder %s614_s14, 1  ;;  %p161_p13 = scmp.lt.s32.totalorder %s614_s14, 3 }
  0x29   : > { %p162_p3 = pnand %p465_p11, %p161_p13 }
  0x2a   : > { %s167_s24 = sand.u32 (!%p162_p3), 1, %s598_s10  }
  0x2b   : > { %165 = sbr.rel (%p162_p3) target bundleno = 212 (0xd4), region = 24  ;;  %s466_s25 = sshll.u32 (!%p162_p3), %s167_s24, 6 }
  0x2c   : > { %s168_s26 = scalar_lea.sflag (!%p162_p3), [#allocation3], %s167_s24  ;;  %s171_s28 = scalar_lea.vmem (!%p162_p3), [#allocation2], %s466_s25 }
  0x32   : > { %589 = dma.done.wait (%p678_p7), %s168_s26, 1024  }
  0x33   : > { %591 = vsyncadd (%p678_p7), %s168_s26, 4294966272  ;;  %p207_p4 = scmp.lt.s32.totalorder %s606_s12, 1  ;;  %vm229_vm0 = vcmask 7168   ;;  %v619_v0 = vmov 0.0   ;;  %v242_v1 = vld [vmem:[%s171_s28 + $0x20] sm:$0xff]  ;;  %v243_v2 = vld [vmem:[%s171_s28 + $0x28] sm:$0xff] }
  0x34   : > { %v238_v3 = vld [vmem:[%s171_s28] sm:$0xff]  ;;  %v256_v4 = vadd.f32 %v243_v2, %v242_v1  ;;  %v239_v5 = vld [vmem:[%s171_s28 + $0x8] sm:$0xff]  ;;  %v244_v6 = vld [vmem:[%s171_s28 + $0x30] sm:$0xff]  ;;  %v279_v20 = vmul.f32 %v242_v1, %v242_v1  ;;  %v280_v21 = vmul.f32 %v243_v2, %v243_v2 }
  0x35   : > { %s827_s12 = smov (!%p207_p4, %s606_s12), 1  ;;  %v245_v7 = vld [vmem:[%s171_s28 + $0x38] sm:$0xff]  ;;  %v250_v8 = vadd.f32 %v239_v5, %v238_v3  ;;  %v240_v9 = vld [vmem:[%s171_s28 + $0x10] sm:$0xff]  ;;  %v275_v14 = vmul.f32 %v238_v3, %v238_v3  ;;  %v276_v15 = vmul.f32 %v239_v5, %v239_v5  ;;  %v281_v18 = vmul.f32 %v244_v6, %v244_v6 }
  0x36   : > { %s474_s27 = sshll.u32 %s827_s12, 5  ;;  %v241_v10 = vld [vmem:[%s171_s28 + $0x18] sm:$0xff]  ;;  %257 = vadd.xlane.f32.xlu1 %v256_v4  ;;  %v259_v11 = vadd.f32 %v245_v7, %v244_v6  ;;  %v277_v12 = vmul.f32 %v240_v9, %v240_v9  ;;  %v282_v19 = vmul.f32 %v245_v7, %v245_v7  ;;  %v289_v24 = vadd.f32 %v280_v21, %v279_v20 }
  0x37   : > { %s746_s3 = scalar_lea.vmem %s814_s1, %s474_s27  ;;  %v278_v13 = vmul.f32 %v241_v10, %v241_v10  ;;  %251 = vadd.xlane.f32.xlu0 %v250_v8  ;;  %v253_v16 = vadd.f32 %v241_v10, %v240_v9  ;;  %v283_v22 = vadd.f32 %v276_v15, %v275_v14  ;;  %s761_s5 = scalar_lea.vmem %s815_s2, %s474_s27 }
  0x38   : > { %232 = vst.msk [vmem:[%s746_s3 + $0x10] sm:$0xff] %vm229_vm0, %v619_v0  ;;  %230 = vst.msk [vmem:[%s746_s3] sm:$0xff] %vm229_vm0, %v619_v0  ;;  %v292_v23 = vadd.f32 %v282_v19, %v281_v18 }
  0x39   : > { %231 = vst.msk [vmem:[%s746_s3 + $0x8] sm:$0xff] %vm229_vm0, %v619_v0  ;;  %233 = vst.msk [vmem:[%s746_s3 + $0x18] sm:$0xff] %vm229_vm0, %v619_v0  ;;  %v286_v17 = vadd.f32 %v278_v13, %v277_v12 }
  0x3a   : > { %260 = vadd.xlane.f32.xlu1 %v259_v11  ;;  %235 = vst.msk [vmem:[%s761_s5 + $0x8] sm:$0xff] %vm229_vm0, %v619_v0  ;;  %234 = vst.msk [vmem:[%s761_s5] sm:$0xff] %vm229_vm0, %v619_v0 }
  0x3b   : > { %254 = vadd.xlane.f32.xlu0 %v253_v16  ;;  %236 = vst.msk [vmem:[%s761_s5 + $0x10] sm:$0xff] %vm229_vm0, %v619_v0  ;;  %237 = vst.msk [vmem:[%s761_s5 + $0x18] sm:$0xff] %vm229_vm0, %v619_v0 }
  0x3e   : > { %287 = vadd.xlane.f32.xlu1 %v286_v17 }
  0x3f   : > { %284 = vadd.xlane.f32.xlu0 %v283_v22  ;;  %v248_v25 = vld [vmem:[%s746_s3 + $0x10] sm:$0xff]  ;;  %v246_v26 = vld [vmem:[%s746_s3] sm:$0xff] }
  0x40   : > { %v249_v31 = vld [vmem:[%s746_s3 + $0x18] sm:$0xff]  ;;  %v247_v32 = vld [vmem:[%s746_s3 + $0x8] sm:$0xff] }
  0x41   : > { %v272_v37 = vld [vmem:[%s761_s5 + $0x8] sm:$0xff]  ;;  %v271_v38 = vld [vmem:[%s761_s5] sm:$0xff] }
  0x42   : > { %293 = vadd.xlane.f32.xlu1 %v292_v23  ;;  %v274_v43 = vld [vmem:[%s761_s5 + $0x18] sm:$0xff]  ;;  %v273_v44 = vld [vmem:[%s761_s5 + $0x10] sm:$0xff] }
  0x43   : > { %290 = vadd.xlane.f32.xlu0 %v289_v24 }
  0xc3   : > { %v258_v27 = vpop.xlane.xlu1 %257 }
  0xc4   : > { %v264_v28 = vadd.f32 %v258_v27, %v248_v25  ;;  %v252_v29 = vpop.xlane.xlu0 %251 }
  0xc5   : > { %v262_v30 = vadd.f32 %v252_v29, %v246_v26 }
  0xc6   : > { %269 = vst.msk [vmem:[%s746_s3 + $0x10] sm:$0xff] %vm229_vm0, %v264_v28 }
  0xc7   : > { %267 = vst.msk [vmem:[%s746_s3] sm:$0xff] %vm229_vm0, %v262_v30  ;;  %v261_v33 = vpop.xlane.xlu1 %260 }
  0xc8   : > { %v265_v34 = vadd.f32 %v261_v33, %v249_v31  ;;  %v255_v35 = vpop.xlane.xlu0 %254 }
  0xc9   : > { %v263_v36 = vadd.f32 %v255_v35, %v247_v32 }
  0xca   : > { %270 = vst.msk [vmem:[%s746_s3 + $0x18] sm:$0xff] %vm229_vm0, %v265_v34 }
  0xcb   : > { %268 = vst.msk [vmem:[%s746_s3 + $0x8] sm:$0xff] %vm229_vm0, %v263_v36  ;;  %v288_v39 = vpop.xlane.xlu1 %287 }
  0xcc   : > { %v296_v40 = vadd.f32 %v288_v39, %v272_v37  ;;  %v285_v41 = vpop.xlane.xlu0 %284 }
  0xcd   : > { %v295_v42 = vadd.f32 %v285_v41, %v271_v38 }
  0xce   : > { %300 = vst.msk [vmem:[%s761_s5 + $0x8] sm:$0xff] %vm229_vm0, %v296_v40 }
  0xcf   : > { %299 = vst.msk [vmem:[%s761_s5] sm:$0xff] %vm229_vm0, %v295_v42  ;;  %v294_v45 = vpop.xlane.xlu1 %293 }
  0xd0   : > { %v298_v46 = vadd.f32 %v294_v45, %v274_v43  ;;  %v291_v47 = vpop.xlane.xlu0 %290 }
  0xd1   : > { %v297_v48 = vadd.f32 %v291_v47, %v273_v44 }
  0xd2   : > { %302 = vst.msk [vmem:[%s761_s5 + $0x18] sm:$0xff] %vm229_vm0, %v298_v46 }
  0xd3   : > { %301 = vst.msk [vmem:[%s761_s5 + $0x10] sm:$0xff] %vm229_vm0, %v297_v48 }
  0xd4 PF: > { %s16_s14 = sadd.s32 1, %s614_s14   ;;  %s819_s9 = smov %s598_s10 }
  0xd5   : > { %p13_p7 = scmp.ge.s32.totalorder %s16_s14, 4   ;;  %s820_s10 = smov %s602_s11 }
  0xd6   : > { %s821_s11 = smov %s684_s21  ;;  %s822_s12 = smov %s610_s13 }
  0xd7   : > { %s823_s13 = smov %s825_s16  ;;  %15 = sbr.rel (!%p13_p7) target bundleno = 4 (0x4), region = 80 }
  0xde   :  { %356 = vsyncpa [#allocation3], 1 }
  0xdf   :  { %358 = vsyncpa [#allocation3 + $0x1], 1 }

</bundles_post_ra>
